<compile_context>
chip_gen: v6e
topology: v6e:2x2x1
jax: 0.10.0
libtpu: 0.0.40
codegen_flags: <defaults>
</compile_context>

<pallas_src>
import functools

import jax
import jax.numpy as jnp
from jax.experimental import pallas as pl
from jax.experimental.pallas import tpu as pltpu


LOGIT_SCALE = 100.0  # CLIP-style logit scale (exp(4.6052) ~= 100), treated as constant.


def _round_up(x, m):
    return ((x + m - 1) // m) * m


def _l2norm(x, axis=-1, eps=1e-12):
    return x * jax.lax.rsqrt(jnp.sum(x * x, axis=axis, keepdims=True) + eps)


# ----------------------------------------------------------------------------- kernel
def rac_kernel(
    x_ref,      # [Bp, CHW]  bf16 flattened image
    wimg_ref,   # [CHW, D]   bf16 image-encoder projection (frozen-encoder stand-in)
    t_ref,      # [NCp, D]   bf16 scale * normalize(T), zero-padded rows >= NC
    f_ref,      # [L, Bp, D] f32  pre-extracted multi-level features
    wf_ref,     # [1, L]     f32  softmax(WF fusion logits)
    w1m_ref,    # [D, Dhp]   bf16 MFA adapter down
    w2m_ref,    # [Dhp, D]   bf16 MFA adapter up
    wze_ref,    # [D, NCp+2*Dhp] bf16 fused [scale*W_cls | W1b | Wa1]
    w1a_ref,    # [NCp, Dhp] bf16 IRA logits branch
    w2i_ref,    # [Dhp, NCp] bf16 IRA ambiguity projection
    wa2_ref,    # [1, Dhp]   f32  ALF alpha-generator up (row vector)
    out_ref,    # out [Bp, NCp] f32 packed: logits in lanes [0,NC), alpha in lane NC
    *, nc, nc_pad, dh_pad,
):
    f32 = jnp.float32
    bf16 = jnp.bfloat16

    # ---- 1. ZeroShotCLIPModule -------------------------------------------------
    z_raw = jnp.dot(x_ref[...], wimg_ref[...], preferred_element_type=f32)    # [Bp, D]
    z_i = _l2norm(z_raw)                                                       # f32
    # contract on the last axis of both operands -> no RHS transpose (no XLU shuffle)
    s_zs = jax.lax.dot_general(
        z_i.astype(bf16), t_ref[...], (((1,), (1,)), ((), ())),
        preferred_element_type=f32)                                            # [Bp, NCp]

    # ---- 2. MFAModule (WF fusion + bottleneck adapter + classifier) ------------
    wf = wf_ref[...]                                                           # [1, L]
    fused = jnp.sum(f_ref[...] * wf[0][:, None, None], axis=0)                 # [Bp, D]
    h_mfa = jnp.maximum(
        jnp.dot((fused + z_i).astype(bf16), w1m_ref[...],
                preferred_element_type=f32), 0.0)                              # [Bp, Dhp]
    z_e = _l2norm(z_i + jnp.dot(h_mfa.astype(bf16), w2m_ref[...],
                                preferred_element_type=f32))                   # [Bp, D]
    # one fused MXU launch for everything fed by z_e
    ze_proj = jnp.dot(z_e.astype(bf16), wze_ref[...], preferred_element_type=f32)
    s_mfa = ze_proj[:, :nc_pad]                                                # [Bp, NCp]
    ze_w1b = ze_proj[:, nc_pad:nc_pad + dh_pad]                                # [Bp, Dhp]
    ze_wa1 = ze_proj[:, nc_pad + dh_pad:]                                      # [Bp, Dhp]

    # ---- 3. IRAModule (remove inter-class ambiguity from ZS logits) ------------
    h_ira = jnp.maximum(
        jnp.dot(s_zs.astype(bf16), w1a_ref[...], preferred_element_type=f32)
        + ze_w1b, 0.0)                                                         # [Bp, Dhp]
    s_ira = s_zs - jnp.dot(h_ira.astype(bf16), w2i_ref[...],
                           preferred_element_type=f32)                         # [Bp, NCp]

    # ---- 4. ALFModule (adaptive logit fusion) ----------------------------------
    # alpha logit via VPU multiply + lane reduce instead of a 1-column MXU launch
    h_alf = jnp.maximum(ze_wa1, 0.0)                                           # [Bp, Dhp]
    alpha = jax.nn.sigmoid(
        jnp.sum(h_alf * wa2_ref[...], axis=-1, keepdims=True))                 # [Bp, 1]
    final = alpha * s_mfa + (1.0 - alpha) * s_ira                              # [Bp, NCp]

    # lane-dense packed output: logits in lanes [0, NC), alpha in lane NC (cols >= NC are 0)
    lane = jax.lax.broadcasted_iota(jnp.int32, final.shape, 1)
    out_ref[...] = jnp.where(lane == nc, alpha, final)


# ----------------------------------------------------------------------------- wrappers
def prepare_params(p):
    """Parameter-only preprocessing, hoisted out of the per-call kernel (run once)."""
    bf16 = jnp.bfloat16
    NC = p["t"].shape[0]
    Dh = p["w1m"].shape[1]
    nc_pad = _round_up(NC + 1, 128)   # +1 lane reserved for alpha in the packed output
    dh_pad = _round_up(Dh, 128)

    t_scaled = jnp.pad(LOGIT_SCALE * _l2norm(p["t"]), ((0, nc_pad - NC), (0, 0)))
    wcls_s = jnp.pad(LOGIT_SCALE * p["wclsm"], ((0, 0), (0, nc_pad - NC)))
    w1b = jnp.pad(p["w1b"], ((0, 0), (0, dh_pad - Dh)))
    wa1 = jnp.pad(p["wa1"], ((0, 0), (0, dh_pad - Dh)))
    w_ze = jnp.concatenate([wcls_s, w1b, wa1], axis=1)           # [D, nc_pad + 2*dh_pad]

    return {
        "wimg": p["wimg"].astype(bf16),
        "t_scaled": t_scaled.astype(bf16),
        "wf": jax.nn.softmax(p["wfuse"], axis=-1).astype(jnp.float32),
        "w1m": jnp.pad(p["w1m"], ((0, 0), (0, dh_pad - Dh))).astype(bf16),
        "w2m": jnp.pad(p["w2m"], ((0, dh_pad - Dh), (0, 0))).astype(bf16),
        "w_ze": w_ze.astype(bf16),
        "w1a": jnp.pad(p["w1a"], ((0, nc_pad - NC), (0, dh_pad - Dh))).astype(bf16),
        "w2i": jnp.pad(p["w2i"], ((0, dh_pad - Dh), (0, nc_pad - NC))).astype(bf16),
        "wa2_row": jnp.pad(p["wa2"][:, 0], (0, dh_pad - Dh))[None, :].astype(jnp.float32),
    }


@functools.partial(jax.jit, static_argnames=("num_classes",))
def rac_forward(x_flat, f_ml, prep, *, num_classes):
    B = x_flat.shape[0]
    nc_pad = prep["t_scaled"].shape[0]
    dh_pad = prep["w1m"].shape[1]
    b_pad = _round_up(max(B, 1), 8)                   # fill f32 sublanes

    x_p = jnp.pad(x_flat, ((0, b_pad - B), (0, 0))).astype(jnp.bfloat16)
    f_p = jnp.pad(f_ml, ((0, 0), (0, b_pad - B), (0, 0))).astype(jnp.float32)

    vmem = pl.BlockSpec(memory_space=pltpu.MemorySpace.VMEM)
    kernel = functools.partial(rac_kernel, nc=num_classes, nc_pad=nc_pad, dh_pad=dh_pad)
    packed = pl.pallas_call(
        kernel,
        out_shape=jax.ShapeDtypeStruct((b_pad, nc_pad), jnp.float32),
        in_specs=[vmem] * 11,
        out_specs=vmem,
    )(x_p, prep["wimg"], prep["t_scaled"], f_p, prep["wf"],
      prep["w1m"], prep["w2m"], prep["w_ze"], prep["w1a"], prep["w2i"], prep["wa2_row"])

    final_logits = packed[:B, :num_classes]
    alpha = packed[:B, num_classes:num_classes + 1]
    return final_logits, alpha


def rac_reference(x_flat, f_ml, p):
    """Pure-JAX reference of the same math (same bf16 operand / f32 accum choices)."""
    bf16, f32 = jnp.bfloat16, jnp.float32

    def mm(a, b):
        return jnp.dot(a.astype(bf16), b.astype(bf16), preferred_element_type=f32)

    z_i = _l2norm(mm(x_flat, p["wimg"]))
    t_scaled = (LOGIT_SCALE * _l2norm(p["t"])).astype(bf16)
    s_zs = jax.lax.dot_general(z_i.astype(bf16), t_scaled, (((1,), (1,)), ((), ())),
                               preferred_element_type=f32)
    wf = jax.nn.softmax(p["wfuse"], axis=-1)[0]
    fused = jnp.sum(f_ml * wf[:, None, None], axis=0)
    h = jnp.maximum(mm(fused + z_i, p["w1m"]), 0.0)
    z_e = _l2norm(z_i + mm(h, p["w2m"]))
    s_mfa = mm(z_e, LOGIT_SCALE * p["wclsm"])
    h_i = jnp.maximum(mm(s_zs, p["w1a"]) + mm(z_e, p["w1b"]), 0.0)
    s_ira = s_zs - mm(h_i, p["w2i"])
    h_a = jnp.maximum(mm(z_e, p["wa1"]), 0.0)
    alpha = jax.nn.sigmoid(jnp.sum(h_a * p["wa2"][:, 0][None, :], axis=-1, keepdims=True))
    return alpha * s_mfa + (1.0 - alpha) * s_ira, alpha


def make_params(key, *, chw, D, NC, L):
    Dh = D // 2  # adapter_bottleneck_ratio = 0.5
    ks = jax.random.split(key, 11)

    def init(k, shape, scale):
        return (scale * jax.random.normal(k, shape)).astype(jnp.float32)

    return {
        "wimg": init(ks[0], (chw, D), 0.02),
        "t":    init(ks[1], (NC, D), 1.0),
        "wfuse": init(ks[2], (1, L), 0.5),
        "w1m": init(ks[3], (D, Dh), 0.05),
        "w2m": init(ks[4], (Dh, D), 0.05),
        "wclsm": init(ks[5], (D, NC), 0.05),
        "w1a": init(ks[6], (NC, Dh), 0.05),
        "w1b": init(ks[7], (D, Dh), 0.05),
        "w2i": init(ks[8], (Dh, NC), 0.05),
        "wa1": init(ks[9], (D, Dh), 0.05),
        "wa2": init(ks[10], (Dh, 1), 0.2),
    }


if __name__ == "__main__":
    # Small shapes consistent with the module's forward:
    #   image_x: (B, C, H, W);  multi_level_features_f: L x (B, feature_dim);
    #   text_features_T: (num_classes, feature_dim)
    B, C, H, W = 2, 4, 16, 16
    D, NC, L = 128, 16, 4

    key = jax.random.PRNGKey(0)
    k_img, k_feat, k_par = jax.random.split(key, 3)
    image_x = jax.random.normal(k_img, (B, C, H, W), dtype=jnp.float32)   # NCHW
    x_flat = image_x.reshape(B, C * H * W)                                # layout glue
    # Pre-extracted multi-level encoder features (the `multi_level_features_f` argument).
    f_ml = jax.random.normal(k_feat, (L, B, D), dtype=jnp.float32)

    params = make_params(k_par, chw=C * H * W, D=D, NC=NC, L=L)
    prep = prepare_params(params)                                         # run once

    final_logits, alpha = rac_forward(x_flat, f_ml, prep, num_classes=NC)
    jax.block_until_ready((final_logits, alpha))

    ref_logits, ref_alpha = rac_reference(x_flat, f_ml, params)
    assert final_logits.shape == (B, NC) and alpha.shape == (B, 1)
    assert jnp.allclose(final_logits, ref_logits, rtol=1e-3, atol=1e-3)
    assert jnp.allclose(alpha, ref_alpha, rtol=1e-3, atol=1e-3)

    print("KERNEL_OK")
</pallas_src>

<mosaic_0001>
module attributes {stable_mosaic.version = 11 : i64} {
  func.func @rac_kernel(%arg0: memref<8x1024xbf16, #tpu.memory_space<vmem>>, %arg1: memref<1024x128xbf16, #tpu.memory_space<vmem>>, %arg2: memref<128x128xbf16, #tpu.memory_space<vmem>>, %arg3: memref<4x8x128xf32, #tpu.memory_space<vmem>>, %arg4: memref<1x4xf32, #tpu.memory_space<vmem>>, %arg5: memref<128x128xbf16, #tpu.memory_space<vmem>>, %arg6: memref<128x128xbf16, #tpu.memory_space<vmem>>, %arg7: memref<128x384xbf16, #tpu.memory_space<vmem>>, %arg8: memref<128x128xbf16, #tpu.memory_space<vmem>>, %arg9: memref<128x128xbf16, #tpu.memory_space<vmem>>, %arg10: memref<1x128xf32, #tpu.memory_space<vmem>>, %arg11: memref<8x128xf32, #tpu.memory_space<vmem>>) attributes {dimension_semantics = [], scalar_prefetch = 0 : i64, scratch_operands = 0 : i64, tpu.core_type = #tpu.core_type<tc>} {
    %c0 = arith.constant 0 : index
    %c0_0 = arith.constant 0 : index
    %0 = vector.load %arg0[%c0, %c0_0] : memref<8x1024xbf16, #tpu.memory_space<vmem>>, vector<8x1024xbf16>
    %c0_1 = arith.constant 0 : index
    %c0_2 = arith.constant 0 : index
    %1 = vector.load %arg1[%c0_1, %c0_2] : memref<1024x128xbf16, #tpu.memory_space<vmem>>, vector<1024x128xbf16>
    %cst = arith.constant dense<0.000000e+00> : vector<8x128xf32>
    %2 = tpu.matmul %0, %1, %cst {dimension_numbers = #tpu.dot_dimension_numbers<[1], [0], [0], [1], [0, 0, 1, 1], [], []>} : vector<8x1024xbf16>, vector<1024x128xbf16>, vector<8x128xf32> -> vector<8x128xf32>
    %3 = arith.mulf %2, %2 : vector<8x128xf32>
    %cst_3 = arith.constant dense<0.000000e+00> : vector<8xf32>
    %4 = vector.multi_reduction <add>, %3, %cst_3 [1] : vector<8x128xf32> to vector<8xf32>
    %5 = vector.shape_cast %4 : vector<8xf32> to vector<8x1xf32>
    %cst_4 = arith.constant 9.99999996E-13 : f32
    %6 = vector.broadcast %cst_4 : f32 to vector<8x1xf32>
    %7 = arith.addf %5, %6 : vector<8x1xf32>
    %8 = math.rsqrt %7 : vector<8x1xf32>
    %9 = vector.broadcast %8 : vector<8x1xf32> to vector<8x128xf32>
    %10 = arith.mulf %2, %9 : vector<8x128xf32>
    %11 = arith.truncf %10 : vector<8x128xf32> to vector<8x128xbf16>
    %c0_5 = arith.constant 0 : index
    %c0_6 = arith.constant 0 : index
    %12 = vector.load %arg2[%c0_5, %c0_6] : memref<128x128xbf16, #tpu.memory_space<vmem>>, vector<128x128xbf16>
    %cst_7 = arith.constant dense<0.000000e+00> : vector<8x128xf32>
    %13 = tpu.matmul %11, %12, %cst_7 {dimension_numbers = #tpu.dot_dimension_numbers<[1], [1], [0], [0], [0, 0, 1, 0], [], []>} : vector<8x128xbf16>, vector<128x128xbf16>, vector<8x128xf32> -> vector<8x128xf32>
    %c0_8 = arith.constant 0 : index
    %c0_9 = arith.constant 0 : index
    %14 = vector.load %arg4[%c0_8, %c0_9] : memref<1x4xf32, #tpu.memory_space<vmem>>, vector<1x4xf32>
    %c0_10 = arith.constant 0 : index
    %c0_11 = arith.constant 0 : index
    %c0_12 = arith.constant 0 : index
    %15 = vector.load %arg3[%c0_10, %c0_11, %c0_12] : memref<4x8x128xf32, #tpu.memory_space<vmem>>, vector<4x8x128xf32>
    %16 = vector.shape_cast %14 : vector<1x4xf32> to vector<4xf32>
    %17 = vector.shape_cast %16 : vector<4xf32> to vector<4x1x1xf32>
    %18 = vector.broadcast %17 : vector<4x1x1xf32> to vector<4x8x128xf32>
    %19 = arith.mulf %15, %18 : vector<4x8x128xf32>
    %cst_13 = arith.constant dense<0.000000e+00> : vector<8x128xf32>
    %20 = vector.multi_reduction <add>, %19, %cst_13 [0] : vector<4x8x128xf32> to vector<8x128xf32>
    %21 = arith.addf %20, %10 : vector<8x128xf32>
    %22 = arith.truncf %21 : vector<8x128xf32> to vector<8x128xbf16>
    %c0_14 = arith.constant 0 : index
    %c0_15 = arith.constant 0 : index
    %23 = vector.load %arg5[%c0_14, %c0_15] : memref<128x128xbf16, #tpu.memory_space<vmem>>, vector<128x128xbf16>
    %cst_16 = arith.constant dense<0.000000e+00> : vector<8x128xf32>
    %24 = tpu.matmul %22, %23, %cst_16 {dimension_numbers = #tpu.dot_dimension_numbers<[1], [0], [0], [1], [0, 0, 1, 1], [], []>} : vector<8x128xbf16>, vector<128x128xbf16>, vector<8x128xf32> -> vector<8x128xf32>
    %cst_17 = arith.constant 0.000000e+00 : f32
    %25 = vector.broadcast %cst_17 : f32 to vector<8x128xf32>
    %26 = arith.maximumf %24, %25 : vector<8x128xf32>
    %27 = arith.truncf %26 : vector<8x128xf32> to vector<8x128xbf16>
    %c0_18 = arith.constant 0 : index
    %c0_19 = arith.constant 0 : index
    %28 = vector.load %arg6[%c0_18, %c0_19] : memref<128x128xbf16, #tpu.memory_space<vmem>>, vector<128x128xbf16>
    %cst_20 = arith.constant dense<0.000000e+00> : vector<8x128xf32>
    %29 = tpu.matmul %27, %28, %cst_20 {dimension_numbers = #tpu.dot_dimension_numbers<[1], [0], [0], [1], [0, 0, 1, 1], [], []>} : vector<8x128xbf16>, vector<128x128xbf16>, vector<8x128xf32> -> vector<8x128xf32>
    %30 = arith.addf %10, %29 : vector<8x128xf32>
    %31 = arith.mulf %30, %30 : vector<8x128xf32>
    %cst_21 = arith.constant dense<0.000000e+00> : vector<8xf32>
    %32 = vector.multi_reduction <add>, %31, %cst_21 [1] : vector<8x128xf32> to vector<8xf32>
    %33 = vector.shape_cast %32 : vector<8xf32> to vector<8x1xf32>
    %cst_22 = arith.constant 9.99999996E-13 : f32
    %34 = vector.broadcast %cst_22 : f32 to vector<8x1xf32>
    %35 = arith.addf %33, %34 : vector<8x1xf32>
    %36 = math.rsqrt %35 : vector<8x1xf32>
    %37 = vector.broadcast %36 : vector<8x1xf32> to vector<8x128xf32>
    %38 = arith.mulf %30, %37 : vector<8x128xf32>
    %39 = arith.truncf %38 : vector<8x128xf32> to vector<8x128xbf16>
    %c0_23 = arith.constant 0 : index
    %c0_24 = arith.constant 0 : index
    %40 = vector.load %arg7[%c0_23, %c0_24] : memref<128x384xbf16, #tpu.memory_space<vmem>>, vector<128x384xbf16>
    %cst_25 = arith.constant dense<0.000000e+00> : vector<8x384xf32>
    %41 = tpu.matmul %39, %40, %cst_25 {dimension_numbers = #tpu.dot_dimension_numbers<[1], [0], [0], [1], [0, 0, 1, 1], [], []>} : vector<8x128xbf16>, vector<128x384xbf16>, vector<8x384xf32> -> vector<8x384xf32>
    %42 = vector.extract_strided_slice %41 {offsets = [0, 0], sizes = [8, 128], strides = [1, 1]} : vector<8x384xf32> to vector<8x128xf32>
    %43 = vector.extract_strided_slice %41 {offsets = [0, 128], sizes = [8, 128], strides = [1, 1]} : vector<8x384xf32> to vector<8x128xf32>
    %44 = vector.extract_strided_slice %41 {offsets = [0, 256], sizes = [8, 128], strides = [1, 1]} : vector<8x384xf32> to vector<8x128xf32>
    %45 = arith.truncf %13 : vector<8x128xf32> to vector<8x128xbf16>
    %c0_26 = arith.constant 0 : index
    %c0_27 = arith.constant 0 : index
    %46 = vector.load %arg8[%c0_26, %c0_27] : memref<128x128xbf16, #tpu.memory_space<vmem>>, vector<128x128xbf16>
    %cst_28 = arith.constant dense<0.000000e+00> : vector<8x128xf32>
    %47 = tpu.matmul %45, %46, %cst_28 {dimension_numbers = #tpu.dot_dimension_numbers<[1], [0], [0], [1], [0, 0, 1, 1], [], []>} : vector<8x128xbf16>, vector<128x128xbf16>, vector<8x128xf32> -> vector<8x128xf32>
    %48 = arith.addf %47, %43 : vector<8x128xf32>
    %cst_29 = arith.constant 0.000000e+00 : f32
    %49 = vector.broadcast %cst_29 : f32 to vector<8x128xf32>
    %50 = arith.maximumf %48, %49 : vector<8x128xf32>
    %51 = arith.truncf %50 : vector<8x128xf32> to vector<8x128xbf16>
    %c0_30 = arith.constant 0 : index
    %c0_31 = arith.constant 0 : index
    %52 = vector.load %arg9[%c0_30, %c0_31] : memref<128x128xbf16, #tpu.memory_space<vmem>>, vector<128x128xbf16>
    %cst_32 = arith.constant dense<0.000000e+00> : vector<8x128xf32>
    %53 = tpu.matmul %51, %52, %cst_32 {dimension_numbers = #tpu.dot_dimension_numbers<[1], [0], [0], [1], [0, 0, 1, 1], [], []>} : vector<8x128xbf16>, vector<128x128xbf16>, vector<8x128xf32> -> vector<8x128xf32>
    %54 = arith.subf %13, %53 : vector<8x128xf32>
    %cst_33 = arith.constant 0.000000e+00 : f32
    %55 = vector.broadcast %cst_33 : f32 to vector<8x128xf32>
    %56 = arith.maximumf %44, %55 : vector<8x128xf32>
    %c0_34 = arith.constant 0 : index
    %c0_35 = arith.constant 0 : index
    %57 = vector.load %arg10[%c0_34, %c0_35] : memref<1x128xf32, #tpu.memory_space<vmem>>, vector<1x128xf32>
    %58 = vector.broadcast %57 : vector<1x128xf32> to vector<8x128xf32>
    %59 = arith.mulf %56, %58 : vector<8x128xf32>
    %cst_36 = arith.constant dense<0.000000e+00> : vector<8xf32>
    %60 = vector.multi_reduction <add>, %59, %cst_36 [1] : vector<8x128xf32> to vector<8xf32>
    %61 = vector.shape_cast %60 : vector<8xf32> to vector<8x1xf32>
    %62 = arith.negf %61 : vector<8x1xf32>
    %63 = math.exp %62 : vector<8x1xf32>
    %cst_37 = arith.constant 1.000000e+00 : f32
    %64 = vector.broadcast %cst_37 : f32 to vector<8x1xf32>
    %65 = arith.addf %64, %63 : vector<8x1xf32>
    %66 = arith.divf %64, %65 : vector<8x1xf32>
    %67 = vector.broadcast %66 : vector<8x1xf32> to vector<8x128xf32>
    %68 = arith.mulf %67, %42 : vector<8x128xf32>
    %cst_38 = arith.constant 1.000000e+00 : f32
    %69 = vector.broadcast %cst_38 : f32 to vector<8x1xf32>
    %70 = arith.subf %69, %66 : vector<8x1xf32>
    %71 = vector.broadcast %70 : vector<8x1xf32> to vector<8x128xf32>
    %72 = arith.mulf %71, %54 : vector<8x128xf32>
    %73 = arith.addf %68, %72 : vector<8x128xf32>
    %74 = tpu.iota {dimensions = array<i32: 1>} : vector<8x128xi32>
    %c16_i32 = arith.constant 16 : i32
    %75 = vector.broadcast %c16_i32 : i32 to vector<8x128xi32>
    %76 = arith.cmpi eq, %74, %75 : vector<8x128xi32>
    %77 = vector.shape_cast %66 : vector<8x1xf32> to vector<8x1xf32>
    %78 = vector.broadcast %77 : vector<8x1xf32> to vector<8x128xf32>
    %79 = arith.select %76, %78, %73 : vector<8x128xi1>, vector<8x128xf32>
    %c0_39 = arith.constant 0 : index
    %c0_40 = arith.constant 0 : index
    %80 = vector.load %arg11[%c0_39, %c0_40] : memref<8x128xf32, #tpu.memory_space<vmem>>, vector<8x128xf32>
    tpu.vector_store %arg11[%c0_39, %c0_40], %79 {strides = array<i32>} : memref<8x128xf32, #tpu.memory_space<vmem>>, vector<8x128xf32>,
    return
  }
}

</mosaic_0001>

<bundles_post_ra>
// kernel: rac_forward.1
= control target key start
LH: loop header
LB: loop body
LE: loop exit
PB: predicated region body
PF: predicated region fallthrough
CT: control target
= control target key end

     0   :  { %16 = vsyncpa [#allocation3], 0  ;;  %s2608_s0 = inlined_call_operand.vmem [shape: bf16[8,1024], index: 0, kind: input, shape index: {}]   ;;  %s2609_s1 = inlined_call_operand.hbm [shape: bf16[1024,128], index: 1, kind: input, shape index: {}]   ;;  %s2610_s2 = inlined_call_operand.vmem [shape: bf16[128,128], index: 2, kind: input, shape index: {}]   ;;  %s2611_s3 = inlined_call_operand.vmem [shape: f32[4,8,128], index: 3, kind: input, shape index: {}]   ;;  %s2612_s4 = inlined_call_operand.vmem [shape: f32[1,4], index: 4, kind: input, shape index: {}]   ;;  %s2613_s5 = inlined_call_operand.hbm [shape: bf16[128,128], index: 5, kind: input, shape index: {}]   ;;  %s2614_s6 = inlined_call_operand.hbm [shape: bf16[128,128], index: 6, kind: input, shape index: {}]   ;;  %s2615_s7 = inlined_call_operand.hbm [shape: bf16[128,384], index: 7, kind: input, shape index: {}]   ;;  %s2616_s8 = inlined_call_operand.hbm [shape: bf16[128,128], index: 8, kind: input, shape index: {}]   ;;  %s2617_s9 = inlined_call_operand.hbm [shape: bf16[128,128], index: 9, kind: input, shape index: {}]   ;;  %s2618_s10 = inlined_call_operand.vmem [shape: f32[1,128], index: 10, kind: input, shape index: {}]   ;;  %s2619_s11 = inlined_call_operand.vmem [shape: f32[8,128], index: 11, kind: output, shape index: {}]  }
   0x1   :  { %17 = vsyncpa [#allocation5], 0 }
   0x2   :  { %18 = vsyncpa [#allocation8], 0 }
   0x3   :  { %19 = vsyncpa [#allocation11], 0  ;;  %s2372_s17 = smov [#allocation4]   ;;  %s2373_s19 = smov [#allocation7]  }
   0x4   :  { %s45_s18 = sshll.u32 %s2372_s17, 4  ;;  %s69_s20 = sshll.u32 %s2373_s19, 4  ;;  %s46_s18 = int_to_ptr.vmem [resolvable:$true] %s45_s18  ;;  %s70_s20 = int_to_ptr.vmem [resolvable:$true] %s69_s20 }
   0x5   :  { %s2252_s21 = scalar_lea.vmem %s46_s18, 1024  ;;  %p2257_p1 = scmp.lt.s32.totalorder %s46_s18, %s46_s18 }
   0x6   :  { %p2253_p0 = scmp.ne.s32.totalorder %s46_s18, %s2252_s21  ;;  %p2258_p2 = scmp.lt.s32.totalorder %s2252_s21, %s2252_s21 }
   0x8   :  { %p2259_p3 = por %p2258_p2, %p2257_p1 }
   0xa   :  { %p2260_p4 = pnand %p2259_p3, %p2253_p0 }
   0xc   :  { %2263 = shalt.err (!%p2260_p4)
}
   0xd   :  { %s2374_s22 = smov 64   ;;  %s2375_s23 = smov 4  }
   0xe   :  { %51 = dma.hbm_to_vmem [thread:$0]  %s2613_s5, 1024, %s46_s18, [#allocation5], %s2374_s22, %s2374_s22, %s2375_s23  }
   0xf   :  { %s2272_s26 = scalar_lea.vmem %s70_s20, 3072  ;;  %p2277_p6 = scmp.lt.s32.totalorder %s70_s20, %s70_s20 }
  0x10   :  { %p2273_p5 = scmp.ne.s32.totalorder %s70_s20, %s2272_s26  ;;  %p2278_p7 = scmp.lt.s32.totalorder %s2272_s26, %s2272_s26 }
  0x12   :  { %p2279_p8 = por %p2278_p7, %p2277_p6 }
  0x14   :  { %p2280_p9 = pnand %p2279_p8, %p2273_p5 }
  0x16   :  { %2283 = shalt.err (!%p2280_p9)
}
  0x17   :  { %s2376_s27 = smov 192   ;;  %s2377_s28 = smov 12  }
  0x18   :  { %75 = dma.hbm_to_vmem [thread:$0]  %s2615_s7, 3072, %s70_s20, [#allocation8], %s2376_s27, %s2376_s27, %s2377_s28  }
  0x19   :  { %s2378_s12 = smov [#allocation2]   ;;  %s2379_s14 = smov [#allocation6]  }
  0x1a   :  { %s27_s13 = sshll.u32 %s2378_s12, 4  ;;  %s57_s15 = sshll.u32 %s2379_s14, 4  ;;  %s28_s13 = int_to_ptr.vmem [resolvable:$true] %s27_s13  ;;  %s58_s15 = int_to_ptr.vmem [resolvable:$true] %s57_s15 }
  0x1b   :  { %s2292_s5 = scalar_lea.vmem %s28_s13, 8192  ;;  %p2297_p11 = scmp.lt.s32.totalorder %s28_s13, %s28_s13 }
  0x1c   :  { %p2293_p10 = scmp.ne.s32.totalorder %s28_s13, %s2292_s5  ;;  %p2298_p12 = scmp.lt.s32.totalorder %s2292_s5, %s2292_s5 }
  0x1e   :  { %p2299_p13 = por %p2298_p12, %p2297_p11 }
  0x20   :  { %p2300_p0 = pnand %p2299_p13, %p2293_p10 }
  0x22   :  { %2303 = shalt.err (!%p2300_p0)
}
  0x23   :  { %33 = dma.hbm_to_vmem [thread:$0]  %s2609_s1, 8192, %s28_s13, [#allocation3], %s2374_s22, %s2374_s22, %s2375_s23  }
  0x24   :  { %s2312_s7 = scalar_lea.vmem %s58_s15, 1024  ;;  %p2317_p2 = scmp.lt.s32.totalorder %s58_s15, %s58_s15 }
  0x25   :  { %p2313_p1 = scmp.ne.s32.totalorder %s58_s15, %s2312_s7  ;;  %p2318_p3 = scmp.lt.s32.totalorder %s2312_s7, %s2312_s7 }
  0x27   :  { %p2319_p4 = por %p2318_p3, %p2317_p2 }
  0x29   :  { %p2320_p5 = pnand %p2319_p4, %p2313_p1 }
  0x2b   :  { %2323 = shalt.err (!%p2320_p5)
}
  0x2c   :  { %63 = dma.hbm_to_vmem [thread:$0]  %s2614_s6, 1024, %s58_s15, [#allocation5], %s2374_s22, %s2374_s22, %s2375_s23  }
  0x2d   :  { %s2380_s20 = smov [#allocation9]   ;;  %s2381_s24 = smov [#allocation10]  }
  0x2e   :  { %s81_s21 = sshll.u32 %s2380_s20, 4  ;;  %s93_s25 = sshll.u32 %s2381_s24, 4  ;;  %s82_s21 = int_to_ptr.vmem [resolvable:$true] %s81_s21  ;;  %s94_s25 = int_to_ptr.vmem [resolvable:$true] %s93_s25 }
  0x2f   :  { %s2332_s1 = scalar_lea.vmem %s82_s21, 1024  ;;  %p2337_p7 = scmp.lt.s32.totalorder %s82_s21, %s82_s21 }
  0x30   :  { %p2333_p6 = scmp.ne.s32.totalorder %s82_s21, %s2332_s1  ;;  %p2338_p8 = scmp.lt.s32.totalorder %s2332_s1, %s2332_s1 }
  0x32   :  { %p2339_p9 = por %p2338_p8, %p2337_p7 }
  0x34   :  { %p2340_p10 = pnand %p2339_p9, %p2333_p6 }
  0x36   :  { %2343 = shalt.err (!%p2340_p10)
}
  0x37   :  { %87 = dma.hbm_to_vmem [thread:$0]  %s2616_s8, 1024, %s82_s21, [#allocation8], %s2374_s22, %s2374_s22, %s2375_s23  }
  0x38   :  { %s2352_s6 = scalar_lea.vmem %s94_s25, 1024  ;;  %p2357_p12 = scmp.lt.s32.totalorder %s94_s25, %s94_s25 }
  0x39   :  { %p2353_p11 = scmp.ne.s32.totalorder %s94_s25, %s2352_s6  ;;  %p2358_p13 = scmp.lt.s32.totalorder %s2352_s6, %s2352_s6 }
  0x3b   :  { %p2359_p0 = por %p2358_p13, %p2357_p12 }
  0x3d   :  { %p2360_p1 = pnand %p2359_p0, %p2353_p11 }
  0x3f   :  { %2363 = shalt.err (!%p2360_p1)
}
  0x40   :  { %99 = dma.hbm_to_vmem [thread:$0]  %s2617_s9, 1024, %s94_s25, [#allocation11], %s2374_s22, %s2374_s22, %s2375_s23  }
  0x41   :  { %2364 = dma.done.wait [#allocation3], 8192  }
  0x42   :  { %2365 = vsyncadd [#allocation3], 4294959104 }
  0x43   :  { %2366 = dma.done.wait [#allocation5], 2048  }
  0x44   :  { %2367 = vsyncadd [#allocation5], 4294965248 }
  0x45   :  { %2368 = dma.done.wait [#allocation8], 4096  }
  0x46   :  { %2369 = vsyncadd [#allocation8], 4294963200 }
  0x47   :  { %2370 = dma.done.wait [#allocation11], 1024  }
  0x48   :  { %2371 = vsyncadd [#allocation11], 4294966272  ;;  %v2092_v0 = vld [vmem:[#allocation2 + $0x78] sm:$0xff]   ;;  %v2096_v4 = vld [vmem:[#allocation2 + $0x70] sm:$0xff]   ;;  %vm2383_vm0 = vmmov 0  }
  0x49   :  { %v2093_v1 = vld [vmem:[#allocation2 + $0xf8] sm:$0xff]   ;;  %1817 = vmatprep.subr.bf16.mxu0 %v2092_v0  ;;  %v2097_v5 = vld [vmem:[#allocation2 + $0xf0] sm:$0xff]   ;;  %v2100_v8 = vld [vmem:[#allocation2 + $0x68] sm:$0xff]  }
  0x4a   :  { %v2094_v2 = vld [vmem:[#allocation2 + $0x38] sm:$0xff]   ;;  %1839 = vmatprep.subr.bf16.mxu1 %v2093_v1  ;;  %v2098_v6 = vld [vmem:[#allocation2 + $0x30] sm:$0xff]   ;;  %v2101_v9 = vld [vmem:[#allocation2 + $0xe8] sm:$0xff]  }
  0x4b   :  { %v2095_v3 = vld [vmem:[#allocation2 + $0xb8] sm:$0xff]   ;;  %1818 = vmatpush3.bf16.msra.mxu0 %v2094_v2  ;;  %v2099_v7 = vld [vmem:[#allocation2 + $0xb0] sm:$0xff]   ;;  %v2102_v10 = vld [vmem:[#allocation2 + $0x28] sm:$0xff]  }
  0x4c   :  { %1840 = vmatpush3.bf16.msra.mxu1 %v2095_v3  ;;  %1819 = vmatprep.subr.bf16.mxu0 %v2096_v4  ;;  %v2103_v11 = vld [vmem:[#allocation2 + $0xa8] sm:$0xff]   ;;  %v2104_v12 = vld [vmem:[#allocation2 + $0x60] sm:$0xff]   ;;  %v2108_v16 = vld [vmem:[#allocation2 + $0x58] sm:$0xff]  }
  0x4d   :  { %1841 = vmatprep.subr.bf16.mxu1 %v2097_v5  ;;  %v2105_v13 = vld [vmem:[#allocation2 + $0xe0] sm:$0xff]   ;;  %v2109_v17 = vld [vmem:[#allocation2 + $0xd8] sm:$0xff]   ;;  %v2112_v20 = vld [vmem:[#allocation2 + $0x50] sm:$0xff]  }
  0x4e   :  { %v2106_v14 = vld [vmem:[#allocation2 + $0x20] sm:$0xff]   ;;  %v2110_v18 = vld [vmem:[#allocation2 + $0x18] sm:$0xff]   ;;  %v2113_v21 = vld [vmem:[#allocation2 + $0xd0] sm:$0xff]  }
  0x4f   :  { %1820 = vmatpush3.bf16.msra.mxu0 %v2098_v6  ;;  %v2107_v15 = vld [vmem:[#allocation2 + $0xa0] sm:$0xff]   ;;  %v2111_v19 = vld [vmem:[#allocation2 + $0x98] sm:$0xff]   ;;  %v2114_v22 = vld [vmem:[#allocation2 + $0x10] sm:$0xff]  }
  0x50   :  { %1842 = vmatpush3.bf16.msra.mxu1 %v2099_v7  ;;  %1821 = vmatprep.subr.bf16.mxu0 %v2100_v8  ;;  %v2115_v23 = vld [vmem:[#allocation2 + $0x90] sm:$0xff]   ;;  %v2116_v24 = vld [vmem:[#allocation2 + $0x48] sm:$0xff]   ;;  %v2120_v28 = vld [vmem:[#allocation2 + $0x40] sm:$0xff]  }
  0x51   :  { %1843 = vmatprep.subr.bf16.mxu1 %v2101_v9  ;;  %v2117_v25 = vld [vmem:[#allocation2 + $0xc8] sm:$0xff]   ;;  %v2121_v29 = vld [vmem:[#allocation2 + $0xc0] sm:$0xff]   ;;  %v2128_v38 = vld [vmem:[#allocation2 + $0x178] sm:$0xff]  }
  0x52   :  { %v2118_v26 = vld [vmem:[#allocation2 + $0x8] sm:$0xff]   ;;  %v2122_v30 = vld [vmem:[#allocation2] sm:$0xff]   ;;  %v2129_v39 = vld [vmem:[#allocation2 + $0x1f8] sm:$0xff]  }
  0x53   :  { %1822 = vmatpush3.bf16.msra.mxu0 %v2102_v10  ;;  %v2119_v27 = vld [vmem:[#allocation2 + $0x88] sm:$0xff]   ;;  %v2123_v31 = vld [vmem:[#allocation2 + $0x80] sm:$0xff]   ;;  %v2130_v40 = vld [vmem:[#allocation2 + $0x138] sm:$0xff]  }
  0x54   :  { %1844 = vmatpush3.bf16.msra.mxu1 %v2103_v11  ;;  %1823 = vmatprep.subr.bf16.mxu0 %v2104_v12  ;;  %v121_v32 = vld [vmem:[%s2608_s0] sm:$0xff]  ;;  %v122_v33 = vld [vmem:[%s2608_s0 + $0x8] sm:$0xff]  ;;  %v2131_v41 = vld [vmem:[#allocation2 + $0x1b8] sm:$0xff]  }
  0x55   :  { %1845 = vmatprep.subr.bf16.mxu1 %v2105_v13  ;;  %v1678_v34 = vcombine.low %v121_v32, %v121_v32  ;;  %v1679_v35 = vcombine.high %v121_v32, %v121_v32  ;;  %v1680_v36 = vcombine.low %v122_v33, %v122_v33  ;;  %v1681_v37 = vcombine.high %v122_v33, %v122_v33  ;;  %v2132_v42 = vld [vmem:[#allocation2 + $0x170] sm:$0xff]   ;;  %v2136_v46 = vld [vmem:[#allocation2 + $0x168] sm:$0xff]   ;;  %v2140_v50 = vld [vmem:[#allocation2 + $0x160] sm:$0xff]  }
  0x56   :  { %v2133_v43 = vld [vmem:[#allocation2 + $0x1f0] sm:$0xff]   ;;  %v2137_v47 = vld [vmem:[#allocation2 + $0x1e8] sm:$0xff]   ;;  %v2141_v51 = vld [vmem:[#allocation2 + $0x1e0] sm:$0xff]   ;;  %v2382_v13 = vmov 0.0  }
  0x57   :  { %1824 = vmatpush3.bf16.msra.mxu0 %v2106_v14  ;;  %697 = vmatprep.mubr.bf16.mxu0 %v1679_v35  ;;  %v2134_v44 = vld [vmem:[#allocation2 + $0x130] sm:$0xff]   ;;  %v2138_v48 = vld [vmem:[#allocation2 + $0x128] sm:$0xff]   ;;  %v2142_v52 = vld [vmem:[#allocation2 + $0x120] sm:$0xff]  }
  0x58   :  { %1846 = vmatpush3.bf16.msra.mxu1 %v2107_v15  ;;  %1825 = vmatprep.subr.bf16.mxu0 %v2108_v16  ;;  %v2135_v45 = vld [vmem:[#allocation2 + $0x1b0] sm:$0xff]   ;;  %v2139_v49 = vld [vmem:[#allocation2 + $0x1a8] sm:$0xff]   ;;  %v2143_v53 = vld [vmem:[#allocation2 + $0x1a0] sm:$0xff]  }
  0x59   :  { %1847 = vmatprep.subr.bf16.mxu1 %v2109_v17  ;;  %737 = vmatprep.mubr.bf16.mxu1 %v1681_v37  ;;  %v2144_v54 = vld [vmem:[#allocation2 + $0x158] sm:$0xff]   ;;  %v2148_v58 = vld [vmem:[#allocation2 + $0x150] sm:$0xff]   ;;  %v2152_v62 = vld [vmem:[#allocation2 + $0x148] sm:$0xff]  }
  0x5a   :  { %v2145_v55 = vld [vmem:[#allocation2 + $0x1d8] sm:$0xff]   ;;  %v2149_v59 = vld [vmem:[#allocation2 + $0x1d0] sm:$0xff]   ;;  %v2153_v63 = vld [vmem:[#allocation2 + $0x1c8] sm:$0xff]  }
  0x5b   :  { %1826 = vmatpush3.bf16.msra.mxu0 %v2110_v18  ;;  %v2146_v56 = vld [vmem:[#allocation2 + $0x118] sm:$0xff]   ;;  %v2150_v60 = vld [vmem:[#allocation2 + $0x110] sm:$0xff]   ;;  %v2154_v0 = vld [vmem:[#allocation2 + $0x108] sm:$0xff]  }
  0x5c   :  { %1848 = vmatpush3.bf16.msra.mxu1 %v2111_v19  ;;  %1827 = vmatprep.subr.bf16.mxu0 %v2112_v20  ;;  %v2147_v57 = vld [vmem:[#allocation2 + $0x198] sm:$0xff]   ;;  %v2151_v61 = vld [vmem:[#allocation2 + $0x190] sm:$0xff]   ;;  %v2155_v1 = vld [vmem:[#allocation2 + $0x188] sm:$0xff]  }
  0x5d   :  { %1849 = vmatprep.subr.bf16.mxu1 %v2113_v21  ;;  %v2156_v2 = vld [vmem:[#allocation2 + $0x140] sm:$0xff]   ;;  %v123_v6 = vld [vmem:[%s2608_s0 + $0x10] sm:$0xff]  ;;  %v124_v9 = vld [vmem:[%s2608_s0 + $0x18] sm:$0xff] }
  0x5e   :  { %v2157_v3 = vld [vmem:[#allocation2 + $0x1c0] sm:$0xff]   ;;  %v1682_v7 = vcombine.low %v123_v6, %v123_v6  ;;  %v1683_v8 = vcombine.high %v123_v6, %v123_v6  ;;  %v1684_v10 = vcombine.low %v124_v9, %v124_v9  ;;  %v1685_v11 = vcombine.high %v124_v9, %v124_v9  ;;  %v2164_v12 = vld [vmem:[%s2610_s2 + $0x38] sm:$0xff]   ;;  %v2170_v15 = vld [vmem:[#allocation4 + $0x30] sm:$0xff]  }
  0x5f   :  { %1828 = vmatpush3.bf16.msra.mxu0 %v2114_v22  ;;  %v2158_v4 = vld [vmem:[#allocation2 + $0x100] sm:$0xff]   ;;  %v2169_v14 = vld [vmem:[#allocation4 + $0x38] sm:$0xff]   ;;  %v2165_v16 = vld [vmem:[%s2610_s2 + $0x30] sm:$0xff]  }
  0x60   :  { %1850 = vmatpush3.bf16.msra.mxu1 %v2115_v23  ;;  %1829 = vmatprep.subr.bf16.mxu0 %v2116_v24  ;;  %v2159_v5 = vld [vmem:[#allocation2 + $0x180] sm:$0xff]   ;;  %v2172_v17 = vld [vmem:[#allocation4 + $0x28] sm:$0xff]   ;;  %v2168_v20 = vld [vmem:[%s2610_s2 + $0x18] sm:$0xff]  }
  0x61   :  { %1851 = vmatprep.subr.bf16.mxu1 %v2117_v25  ;;  %v2166_v18 = vld [vmem:[%s2610_s2 + $0x28] sm:$0xff]   ;;  %v2167_v19 = vld [vmem:[%s2610_s2 + $0x20] sm:$0xff]   ;;  %v2171_v21 = vld [vmem:[%s2610_s2 + $0x10] sm:$0xff]  }
  0x63   :  { %1830 = vmatpush3.bf16.msra.mxu0 %v2118_v26 }
  0x64   :  { %1852 = vmatpush3.bf16.msra.mxu1 %v2119_v27  ;;  %1831 = vmatprep.subr.bf16.mxu0 %v2120_v28 }
  0x65   :  { %1853 = vmatprep.subr.bf16.mxu1 %v2121_v29 }
  0x67   :  { %1832 = vmatpush3.bf16.msra.mxu0 %v2122_v30 }
  0x68   :  { %1854 = vmatpush3.bf16.msra.mxu1 %v2123_v31  ;;  %1861 = vmatprep.subr.bf16.mxu0 %v2128_v38 }
  0x69   :  { %1883 = vmatprep.subr.bf16.mxu1 %v2129_v39 }
  0x6a   :  { %698 = vmatmul.mubr.bf16.vlgmr.msra.gmra.mxu0 %v1678_v34 }
  0x6b   :  { %738 = vmatmul.mubr.bf16.vlgmr.msra.gmra.mxu1 %v1680_v36  ;;  %1862 = vmatpush3.bf16.msra.mxu0 %v2130_v40 }
  0x6c   :  { %1884 = vmatpush3.bf16.msra.mxu1 %v2131_v41  ;;  %1863 = vmatprep.subr.bf16.mxu0 %v2132_v42 }
  0x6d   :  { %1885 = vmatprep.subr.bf16.mxu1 %v2133_v43  ;;  %777 = vmatprep.mubr.bf16.mxu0 %v1683_v8 }
  0x6e   :  { %817 = vmatprep.mubr.bf16.mxu1 %v1685_v11 }
  0x6f   :  { %1864 = vmatpush3.bf16.msra.mxu0 %v2134_v44 }
  0x70   :  { %1886 = vmatpush3.bf16.msra.mxu1 %v2135_v45  ;;  %1865 = vmatprep.subr.bf16.mxu0 %v2136_v46  ;;  %v2173_v46 = vld [vmem:[#allocation4 + $0x20] sm:$0xff]  }
  0x71   :  { %1887 = vmatprep.subr.bf16.mxu1 %v2137_v47  ;;  %v2174_v47 = vld [vmem:[%s2610_s2 + $0x8] sm:$0xff]  }
  0x73   :  { %1866 = vmatpush3.bf16.msra.mxu0 %v2138_v48  ;;  %v2175_v48 = vld [vmem:[#allocation4 + $0x18] sm:$0xff]  }
  0x74   :  { %1888 = vmatpush3.bf16.msra.mxu1 %v2139_v49  ;;  %1867 = vmatprep.subr.bf16.mxu0 %v2140_v50  ;;  %v1758_v49 = vld [vmem:[%s2612_s4] ss:$0 sm:$0xff]  ;;  %v2176_v50 = vld [vmem:[#allocation4 + $0x10] sm:$0xff]  }
  0x75   :  { %1889 = vmatprep.subr.bf16.mxu1 %v2141_v51  ;;  %v2177_v51 = vld [vmem:[%s2610_s2] sm:$0xff]  }
  0x77   :  { %1868 = vmatpush3.bf16.msra.mxu0 %v2142_v52  ;;  %v2178_v52 = vld [vmem:[#allocation4 + $0x8] sm:$0xff]  }
  0x78   :  { %1890 = vmatpush3.bf16.msra.mxu1 %v2143_v53  ;;  %1869 = vmatprep.subr.bf16.mxu0 %v2144_v54  ;;  %v2179_v53 = vld [vmem:[#allocation4] sm:$0xff]   ;;  %v948_v54 = vlaneseq }
  0x79   :  { %1891 = vmatprep.subr.bf16.mxu1 %v2145_v55 }
  0x7a   :  { %v949_v55 = vshrl.u32 %v948_v54, 7 }
  0x7b   :  { %1870 = vmatpush3.bf16.msra.mxu0 %v2146_v56 }
  0x7c   :  { %1892 = vmatpush3.bf16.msra.mxu1 %v2147_v57  ;;  %1871 = vmatprep.subr.bf16.mxu0 %v2148_v58  ;;  %v950_v58 = vsub.s32 0, %v949_v55 }
  0x7d   :  { %1893 = vmatprep.subr.bf16.mxu1 %v2149_v59  ;;  %v954_v59 = vsub.s32 1, %v949_v55 }
  0x7f   :  { %1872 = vmatpush3.bf16.msra.mxu0 %v2150_v60  ;;  %v958_v60 = vsub.s32 2, %v949_v55 }
  0x80   :  { %1894 = vmatpush3.bf16.msra.mxu1 %v2151_v61  ;;  %1873 = vmatprep.subr.bf16.mxu0 %v2152_v62  ;;  %v937_v61 = vld [vmem:[%s2611_s3] sm:$0xff]  ;;  %v938_v62 = vld [vmem:[%s2611_s3 + $0x8] sm:$0xff] }
  0x81   :  { %1895 = vmatprep.subr.bf16.mxu1 %v2153_v63 }
  0x83   :  { %1874 = vmatpush3.bf16.msra.mxu0 %v2154_v0  ;;  %v962_v0 = vsub.s32 3, %v949_v55 }
  0x84   :  { %1896 = vmatpush3.bf16.msra.mxu1 %v2155_v1  ;;  %1875 = vmatprep.subr.bf16.mxu0 %v2156_v2 }
  0x85   :  { %1897 = vmatprep.subr.bf16.mxu1 %v2157_v3 }
  0x87   :  { %1876 = vmatpush3.bf16.msra.mxu0 %v2158_v4  ;;  %v939_v4 = vld [vmem:[%s2611_s3 + $0x10] sm:$0xff] }
  0x88   :  { %1898 = vmatpush3.bf16.msra.mxu1 %v2159_v5  ;;  %1959 = vmatprep.subr.bf16.mxu0 %v2382_v13 }
  0x89   :  { %1979 = vmatprep.subr.bf16.mxu1 %v2382_v13 }
  0x8a   :  { %778 = vmatmul.mubr.bf16.vlgmr.msra.gmra.mxu0 %v1682_v7 }
  0x8b   :  { %818 = vmatmul.mubr.bf16.vlgmr.msra.gmra.mxu1 %v1684_v10  ;;  %1960 = vmatpush3.bf16.xpose.msra.mxu0 %v2164_v12  ;;  %v940_v10 = vld [vmem:[%s2611_s3 + $0x18] sm:$0xff] }
  0x8c   :  { %1961 = vmatprep.subr.bf16.mxu0 %v2382_v13  ;;  %1980 = vmatpush3.bf16.msra.mxu1 %v2169_v14 }
  0x8d   :  { %1981 = vmatprep.subr.bf16.mxu1 %v2382_v13  ;;  %1975 = vmatprep.mubr.msk.bf16.mxu0 %vm2383_vm0, %v2382_v13 }
  0x8e   :  { %1995 = vmatprep.mubr.msk.bf16.mxu1 %vm2383_vm0, %v2382_v13 }
  0x90   :  { %1982 = vmatpush3.bf16.msra.mxu1 %v2170_v15 }
  0x91   :  { %1983 = vmatprep.subr.bf16.mxu1 %v2382_v13 }
  0x93   :  { %1962 = vmatpush3.bf16.xpose.msra.mxu0 %v2165_v16 }
  0x94   :  { %1963 = vmatprep.subr.bf16.mxu0 %v2382_v13  ;;  %1984 = vmatpush3.bf16.msra.mxu1 %v2172_v17 }
  0x95   :  { %1985 = vmatprep.subr.bf16.mxu1 %v2382_v13 }
  0x98   :  { %1986 = vmatpush3.bf16.msra.mxu1 %v2173_v46  ;;  %v2196_v46 = vld [vmem:[#allocation7 + $0x78] ss:$12 sps:$4 sm:$0xff]  }
  0x99   :  { %1987 = vmatprep.subr.bf16.mxu1 %v2382_v13 }
  0x9b   :  { %1964 = vmatpush3.bf16.xpose.msra.mxu0 %v2166_v18 }
  0x9c   :  { %1965 = vmatprep.subr.bf16.mxu0 %v2382_v13  ;;  %1988 = vmatpush3.bf16.msra.mxu1 %v2175_v48  ;;  %v2200_v48 = vld [vmem:[#allocation7 + $0x60] ss:$12 sps:$4 sm:$0xff]  }
  0x9d   :  { %1989 = vmatprep.subr.bf16.mxu1 %v2382_v13 }
  0xa0   :  { %1990 = vmatpush3.bf16.msra.mxu1 %v2176_v50 }
  0xa1   :  { %1991 = vmatprep.subr.bf16.mxu1 %v2382_v13 }
  0xa3   :  { %1966 = vmatpush3.bf16.xpose.msra.mxu0 %v2167_v19  ;;  %v2180_v19 = vld [vmem:[#allocation6 + $0x38] sm:$0xff]  }
  0xa4   :  { %1967 = vmatprep.subr.bf16.mxu0 %v2382_v13  ;;  %1992 = vmatpush3.bf16.msra.mxu1 %v2178_v52 }
  0xa5   :  { %1993 = vmatprep.subr.bf16.mxu1 %v2382_v13 }
  0xa8   :  { %1994 = vmatpush3.bf16.msra.mxu1 %v2179_v53 }
  0xa9   :  { %1999 = vmatprep.subr.bf16.mxu1 %v2382_v13 }
  0xab   :  { %1968 = vmatpush3.bf16.xpose.msra.mxu0 %v2168_v20 }
  0xac   :  { %1969 = vmatprep.subr.bf16.mxu0 %v2382_v13 }
  0xb3   :  { %1970 = vmatpush3.bf16.xpose.msra.mxu0 %v2171_v21  ;;  %v2181_v21 = vld [vmem:[#allocation6 + $0x30] sm:$0xff]  }
  0xb4   :  { %1971 = vmatprep.subr.bf16.mxu0 %v2382_v13 }
  0xbb   :  { %1972 = vmatpush3.bf16.xpose.msra.mxu0 %v2174_v47  ;;  %v2202_v47 = vld [vmem:[#allocation7 + $0x64] ss:$12 sps:$4 sm:$0xff]  }
  0xbc   :  { %1973 = vmatprep.subr.bf16.mxu0 %v2382_v13 }
  0xc3   :  { %1974 = vmatpush3.bf16.xpose.msra.mxu0 %v2177_v51 }
 0x12a   :  { %v1833_v22 = vpop.f32.mrf.mxu0 }
 0x12b   :  { %v1855_v23 = vpop.f32.mrf.mxu1 }
 0x12c   :  { %v1834_v24 = vpop.f32.mrf.mxu0 }
 0x12d   :  { %v1856_v25 = vpop.f32.mrf.mxu1  ;;  %v1835_v30 = vadd.f32 %v1834_v24, %v1833_v22  ;;  %v2182_v22 = vld [vmem:[#allocation6 + $0x28] sm:$0xff]   ;;  %v2184_v24 = vld [vmem:[#allocation6 + $0x18] sm:$0xff]  }
 0x12e   :  { %v1836_v26 = vpop.f32.mrf.mxu0  ;;  %v1857_v31 = vadd.f32 %v1856_v25, %v1855_v23  ;;  %v2183_v23 = vld [vmem:[#allocation6 + $0x20] sm:$0xff]   ;;  %v2185_v25 = vld [vmem:[#allocation6 + $0x10] sm:$0xff]  }
 0x12f   :  { %v1858_v27 = vpop.f32.mrf.mxu1  ;;  %v2186_v26 = vld [vmem:[#allocation6 + $0x8] sm:$0xff]  }
 0x130   :  { %v1837_v28 = vpop.f32.mrf.mxu0  ;;  %v740_v36 = vadd.f32 %v1857_v31, %v1835_v30  ;;  %v2187_v27 = vld [vmem:[#allocation6] sm:$0xff]  }
 0x131   :  { %v1859_v29 = vpop.f32.mrf.mxu1 }
 0x14a   :  { %v1877_v32 = vpop.f32.mrf.mxu0 }
 0x14b   :  { %v1899_v33 = vpop.f32.mrf.mxu1 }
 0x14c   :  { %v1878_v34 = vpop.f32.mrf.mxu0 }
 0x14d   :  { %v1900_v35 = vpop.f32.mrf.mxu1  ;;  %v1879_v37 = vadd.f32 %v1878_v34, %v1877_v32 }
 0x14e   :  { %v1880_v38 = vpop.f32.mrf.mxu0  ;;  %v1901_v41 = vadd.f32 %v1900_v35, %v1899_v33 }
 0x14f   :  { %v1902_v39 = vpop.f32.mrf.mxu1  ;;  %v780_v40 = vadd.f32 %v1879_v37, %v740_v36  ;;  %v2188_v38 = vld [vmem:[#allocation7 + $0xa8] ss:$12 sps:$4 sm:$0xff]  }
 0x150   :  { %v1881_v42 = vpop.f32.mrf.mxu0  ;;  %v2190_v39 = vld [vmem:[#allocation7 + $0xac] ss:$12 sps:$4 sm:$0xff]  }
 0x151   :  { %v1903_v43 = vpop.f32.mrf.mxu1  ;;  %v820_v44 = vadd.f32 %v1901_v41, %v780_v40  ;;  %v2191_v40 = vld [vmem:[#allocation7 + $0xb0] ss:$12 sps:$4 sm:$0xff]   ;;  %v2194_v41 = vld [vmem:[#allocation7 + $0x94] ss:$12 sps:$4 sm:$0xff]   ;;  %1351 = vmatprep.subr.bf16.mxu0 %v2190_v39  ;;  %v2195_v42 = vld [vmem:[#allocation7 + $0x98] ss:$12 sps:$4 sm:$0xff]  }
 0x152   :  { %v2192_v43 = vld [vmem:[#allocation7 + $0x90] ss:$12 sps:$4 sm:$0xff]  }
 0x153   :  { %v825_v45 = vmul.f32 %v820_v44, %v820_v44 }
 0x155   :  { %826 = vadd.xlane.f32.xlu0 %v825_v45  ;;  %v2199_v45 = vld [vmem:[#allocation7 + $0x80] ss:$12 sps:$4 sm:$0xff]  }
 0x16b   :  { %946 = vbcast.lane.b32.xlu0 %v1758_v49, 256 }
 0x1de   :  { %v827_v56 = vpop.xlane.xlu0 %826 }
 0x1df   :  { %v828_v57 = vadd.f32 1e-12, %v827_v56  ;;  %v2203_v56 = vld [vmem:[#allocation7 + $0x68] ss:$12 sps:$4 sm:$0xff]  }
 0x1e1   :  { %2236 = vrsqrt.f32 %v828_v57  ;;  %v2206_v57 = vld [vmem:[#allocation7 + $0x4c] ss:$12 sps:$4 sm:$0xff]  }
 0x1e2   :  { %v947_v63 = vpop.permute.xlu0 %946 }
 0x1e3   :  { %v951_v1 = vrot.slane %v947_v63, %v950_v58  ;;  %v955_v2 = vrot.slane %v947_v63, %v954_v59  ;;  %v959_v3 = vrot.slane %v947_v63, %v958_v60  ;;  %v963_v7 = vrot.slane %v947_v63, %v962_v0  ;;  %v2204_v58 = vld [vmem:[#allocation7 + $0x48] ss:$12 sps:$4 sm:$0xff]   ;;  %v2207_v59 = vld [vmem:[#allocation7 + $0x50] ss:$12 sps:$4 sm:$0xff]  }
 0x1e4   :  { %v2210_v60 = vld [vmem:[#allocation7 + $0x34] ss:$12 sps:$4 sm:$0xff]   ;;  %v2214_v63 = vld [vmem:[#allocation7 + $0x1c] ss:$12 sps:$4 sm:$0xff]   ;;  %v2384_v0 = vmov 0  }
 0x1e5   :  { %v964_v5 = vmul.f32 %v951_v1, %v937_v61  ;;  %v965_v6 = vmul.f32 %v955_v2, %v938_v62  ;;  %v966_v8 = vmul.f32 %v959_v3, %v939_v4  ;;  %v967_v11 = vmul.f32 %v963_v7, %v940_v10  ;;  %v2208_v61 = vld [vmem:[#allocation7 + $0x30] ss:$12 sps:$4 sm:$0xff]   ;;  %v2211_v62 = vld [vmem:[#allocation7 + $0x38] ss:$12 sps:$4 sm:$0xff]   ;;  %v2215_v2 = vld [vmem:[#allocation7 + $0x20] ss:$12 sps:$4 sm:$0xff]  }
 0x1e6   :  { %v2212_v1 = vld [vmem:[#allocation7 + $0x18] ss:$12 sps:$4 sm:$0xff]   ;;  %v2216_v4 = vld [vmem:[#allocation7] ss:$12 sps:$4 sm:$0xff]  }
 0x1e7   :  { %v968_v9 = vadd.f32 %v965_v6, %v964_v5  ;;  %v2218_v3 = vld [vmem:[#allocation7 + $0x4] ss:$12 sps:$4 sm:$0xff]   ;;  %v2219_v5 = vld [vmem:[#allocation7 + $0x8] ss:$12 sps:$4 sm:$0xff]   ;;  %v2220_v10 = vld [vmem:[#allocation9 + $0x38] sm:$0xff]  }
 0x1e9   :  { %v969_v12 = vadd.f32 %v968_v9, %v966_v8 }
 0x1eb   :  { %v970_v15 = vadd.f32 %v969_v12, %v967_v11  ;;  %v2221_v12 = vld [vmem:[#allocation9 + $0x30] sm:$0xff]  }
 0x1ee   :  { %v2237_v14 = vpop.eup %2236 }
 0x1ef   :  { %v2551_v16 = vmul.f32 %v2237_v14, %v820_v44  ;;  %v2198_v44 = vld [vmem:[#allocation7 + $0x7c] ss:$12 sps:$4 sm:$0xff]  }
 0x1f0   :  { %v2222_v14 = vld [vmem:[#allocation9 + $0x28] sm:$0xff]  }
 0x1f1   :  { %v831_v17 = vpack.c.bf16 %v2551_v16, %v2551_v16  ;;  %v971_v18 = vadd.f32 %v970_v15, %v2551_v16  ;;  %v2223_v15 = vld [vmem:[#allocation9 + $0x20] sm:$0xff]  }
 0x1f3   :  { %1976 = vmatmul.mubr.bf16.vlgmr.msra.gmra.mxu0 %v831_v17  ;;  %v972_v20 = vpack.c.bf16 %v971_v18, %v971_v18  ;;  %v2225_v17 = vld [vmem:[#allocation9 + $0x10] sm:$0xff]   ;;  %v2226_v18 = vld [vmem:[#allocation9 + $0x8] sm:$0xff]  }
 0x1f4   :  { %1352 = vmatpush1.bf16.msra.mxu0 %v2188_v38  ;;  %1383 = vmatprep.mubr.bf16.mxu0 %v2384_v0 }
 0x1f5   :  { %1996 = vmatmul.mubr.bf16.vlgmr.msra.gmra.mxu1 %v972_v20  ;;  %1353 = vmatprep.subr.bf16.mxu0 %v2194_v41 }
 0x1f6   :  { %2000 = vmatpush3.bf16.msra.mxu1 %v2180_v19  ;;  %2015 = vmatprep.mubr.msk.bf16.mxu1 %vm2383_vm0, %v2382_v13  ;;  %v2227_v19 = vld [vmem:[#allocation9] sm:$0xff]  }
 0x1f7   :  { %2001 = vmatprep.subr.bf16.mxu1 %v2382_v13 }
 0x1f8   :  { %1354 = vmatpush1.bf16.msra.mxu0 %v2192_v43 }
 0x1f9   :  { %1355 = vmatprep.subr.bf16.mxu0 %v2198_v44 }
 0x1fa   :  { %2002 = vmatpush3.bf16.msra.mxu1 %v2181_v21  ;;  %v2228_v21 = vld [vmem:[#allocation10 + $0x38] sm:$0xff]  }
 0x1fb   :  { %2003 = vmatprep.subr.bf16.mxu1 %v2382_v13 }
 0x1fc   :  { %1356 = vmatpush1.bf16.msra.mxu0 %v2196_v46 }
 0x1fd   :  { %1357 = vmatprep.subr.bf16.mxu0 %v2202_v47 }
 0x1fe   :  { %2004 = vmatpush3.bf16.msra.mxu1 %v2182_v22  ;;  %v2229_v22 = vld [vmem:[#allocation10 + $0x30] sm:$0xff]  }
 0x1ff   :  { %2005 = vmatprep.subr.bf16.mxu1 %v2382_v13 }
 0x200   :  { %1358 = vmatpush1.bf16.msra.mxu0 %v2200_v48 }
 0x201   :  { %1359 = vmatprep.subr.bf16.mxu0 %v2206_v57 }
 0x202   :  { %2006 = vmatpush3.bf16.msra.mxu1 %v2183_v23  ;;  %v2230_v23 = vld [vmem:[#allocation10 + $0x28] sm:$0xff]  }
 0x203   :  { %2007 = vmatprep.subr.bf16.mxu1 %v2382_v13 }
 0x204   :  { %1360 = vmatpush1.bf16.msra.mxu0 %v2204_v58 }
 0x205   :  { %1361 = vmatprep.subr.bf16.mxu0 %v2210_v60 }
 0x206   :  { %2008 = vmatpush3.bf16.msra.mxu1 %v2184_v24  ;;  %v2231_v24 = vld [vmem:[#allocation10 + $0x20] sm:$0xff]  }
 0x207   :  { %2009 = vmatprep.subr.bf16.mxu1 %v2382_v13 }
 0x208   :  { %1362 = vmatpush1.bf16.msra.mxu0 %v2208_v61 }
 0x209   :  { %1363 = vmatprep.subr.bf16.mxu0 %v2214_v63 }
 0x20a   :  { %2010 = vmatpush3.bf16.msra.mxu1 %v2185_v25  ;;  %v2232_v25 = vld [vmem:[#allocation10 + $0x18] sm:$0xff]  }
 0x20b   :  { %2011 = vmatprep.subr.bf16.mxu1 %v2382_v13 }
 0x20c   :  { %1364 = vmatpush1.bf16.msra.mxu0 %v2212_v1 }
 0x20d   :  { %1365 = vmatprep.subr.bf16.mxu0 %v2218_v3 }
 0x20e   :  { %2012 = vmatpush3.bf16.msra.mxu1 %v2186_v26  ;;  %v2233_v26 = vld [vmem:[#allocation10 + $0x10] sm:$0xff]  }
 0x20f   :  { %2013 = vmatprep.subr.bf16.mxu1 %v2382_v13 }
 0x210   :  { %1366 = vmatpush1.bf16.msra.mxu0 %v2216_v4 }
 0x211   :  { %2039 = vmatprep.subr.bf16.mxu0 %v2382_v13 }
 0x212   :  { %2014 = vmatpush3.bf16.msra.mxu1 %v2187_v27  ;;  %v2234_v27 = vld [vmem:[#allocation10 + $0x8] sm:$0xff]  }
 0x213   :  { %2019 = vmatprep.subr.bf16.mxu1 %v2382_v13 }
 0x2b3   :  { %v2566_v28 = vpop.f32.mrf.mxu0 }
 0x2b4   :  { %v1432_v20 = vpack.c.bf16 %v2566_v28, %v2566_v28 }
 0x2b5   :  { %v1977_v29 = vpop.f32.mrf.mxu0  ;;  %v1071_v30 = vpop.f32.mrf.mxu1 }
 0x2b6   :  { %v1077_v31 = vmax.f32 %v1071_v30, 0.0  ;;  %v2235_v29 = vld [vmem:[#allocation10] sm:$0xff]  }
 0x2b7   :  { %v933_v32 = vpop.f32.mrf.mxu0  ;;  %v1997_v33 = vpop.f32.mrf.mxu1 }
 0x2b8   :  { %v1078_v34 = vpack.c.bf16 %v1077_v31, %v1077_v31  ;;  %v1815_v32 = vld [vmem:[%s2618_s10] ss:$0 sm:$0xff] }
 0x2b9   :  { %v1978_v35 = vpop.f32.mrf.mxu0  ;;  %v1074_v36 = vpop.f32.mrf.mxu1 }
 0x2ba   :  { %2016 = vmatmul.mubr.bf16.vlgmr.msra.gmra.mxu1 %v1078_v34 }
 0x2bb   :  { %v1998_v37 = vpop.f32.mrf.mxu1  ;;  %2035 = vmatprep.mubr.msk.bf16.mxu1 %vm2383_vm0, %v2382_v13  ;;  %2020 = vmatpush3.bf16.msra.mxu1 %v2191_v40 }
 0x2bc   :  { %2021 = vmatprep.subr.bf16.mxu1 %v2382_v13 }
 0x2bf   :  { %2022 = vmatpush3.bf16.msra.mxu1 %v2195_v42 }
 0x2c0   :  { %2023 = vmatprep.subr.bf16.mxu1 %v2382_v13 }
 0x2c3   :  { %2024 = vmatpush3.bf16.msra.mxu1 %v2199_v45 }
 0x2c4   :  { %2025 = vmatprep.subr.bf16.mxu1 %v2382_v13 }
 0x2c7   :  { %2026 = vmatpush3.bf16.msra.mxu1 %v2203_v56 }
 0x2c8   :  { %2027 = vmatprep.subr.bf16.mxu1 %v2382_v13 }
 0x2cb   :  { %2028 = vmatpush3.bf16.msra.mxu1 %v2207_v59 }
 0x2cc   :  { %2029 = vmatprep.subr.bf16.mxu1 %v2382_v13 }
 0x2cf   :  { %2030 = vmatpush3.bf16.msra.mxu1 %v2211_v62 }
 0x2d0   :  { %2031 = vmatprep.subr.bf16.mxu1 %v2382_v13 }
 0x2d3   :  { %2032 = vmatpush3.bf16.msra.mxu1 %v2215_v2 }
 0x2d4   :  { %2033 = vmatprep.subr.bf16.mxu1 %v2382_v13 }
 0x2d7   :  { %2034 = vmatpush3.bf16.msra.mxu1 %v2219_v5 }
 0x2d8   :  { %2059 = vmatprep.subr.bf16.mxu1 %v2382_v13 }
 0x37a   :  { %v1177_v49 = vpop.f32.mrf.mxu1 }
 0x37b   :  { %v1183_v50 = vadd.f32 %v1177_v49, %v2551_v16  ;;  %v2224_v16 = vld [vmem:[#allocation9 + $0x18] sm:$0xff]  }
 0x37c   :  { %v2017_v51 = vpop.f32.mrf.mxu1 }
 0x37d   :  { %v1184_v52 = vmul.f32 %v1183_v50, %v1183_v50 }
 0x37e   :  { %v1180_v53 = vpop.f32.mrf.mxu1 }
 0x37f   :  { %1185 = vadd.xlane.f32.xlu1 %v1184_v52  ;;  %v1666_v53 = vand.u32 127, %v948_v54 }
 0x380   :  { %v2018_v55 = vpop.f32.mrf.mxu1 }
 0x381   :  { %vm1667_vm1 = vcmp.eq.s32.totalorder %v1666_v53, 16 }
 0x408   :  { %v1186_v6 = vpop.xlane.xlu1 %1185 }
 0x409   :  { %v1187_v7 = vadd.f32 1e-12, %v1186_v6 }
 0x40b   :  { %2238 = vrsqrt.f32 %v1187_v7 }
 0x418   :  { %v2239_v8 = vpop.eup %2238 }
 0x419   :  { %v1189_v9 = vmul.f32 %v2239_v8, %v1183_v50 }
 0x41b   :  { %v1190_v11 = vpack.c.bf16 %v1189_v9, %v1189_v9 }
 0x41d   :  { %1384 = vmatmul.mubr.bf16.vlgmr.msra.gmra.mxu0 %v1190_v11  ;;  %2036 = vmatmul.mubr.bf16.vlgmr.msra.gmra.mxu1 %v1190_v11 }
 0x41e   :  { %2040 = vmatpush3.bf16.msra.mxu0 %v2220_v10  ;;  %2055 = vmatprep.mubr.msk.bf16.mxu0 %vm2383_vm0, %v2382_v13 }
 0x41f   :  { %2041 = vmatprep.subr.bf16.mxu0 %v2382_v13  ;;  %2075 = vmatprep.mubr.msk.bf16.mxu1 %vm2383_vm0, %v2382_v13 }
 0x420   :  { %2060 = vmatpush3.bf16.msra.mxu1 %v2228_v21 }
 0x421   :  { %2061 = vmatprep.subr.bf16.mxu1 %v2382_v13 }
 0x422   :  { %2042 = vmatpush3.bf16.msra.mxu0 %v2221_v12 }
 0x423   :  { %2043 = vmatprep.subr.bf16.mxu0 %v2382_v13 }
 0x424   :  { %2062 = vmatpush3.bf16.msra.mxu1 %v2229_v22 }
 0x425   :  { %2063 = vmatprep.subr.bf16.mxu1 %v2382_v13 }
 0x426   :  { %2044 = vmatpush3.bf16.msra.mxu0 %v2222_v14 }
 0x427   :  { %2045 = vmatprep.subr.bf16.mxu0 %v2382_v13 }
 0x428   :  { %2064 = vmatpush3.bf16.msra.mxu1 %v2230_v23 }
 0x429   :  { %2065 = vmatprep.subr.bf16.mxu1 %v2382_v13 }
 0x42a   :  { %2046 = vmatpush3.bf16.msra.mxu0 %v2223_v15 }
 0x42b   :  { %2047 = vmatprep.subr.bf16.mxu0 %v2382_v13 }
 0x42c   :  { %2066 = vmatpush3.bf16.msra.mxu1 %v2231_v24 }
 0x42d   :  { %2067 = vmatprep.subr.bf16.mxu1 %v2382_v13 }
 0x42e   :  { %2048 = vmatpush3.bf16.msra.mxu0 %v2224_v16 }
 0x42f   :  { %2049 = vmatprep.subr.bf16.mxu0 %v2382_v13 }
 0x430   :  { %2068 = vmatpush3.bf16.msra.mxu1 %v2232_v25 }
 0x431   :  { %2069 = vmatprep.subr.bf16.mxu1 %v2382_v13 }
 0x432   :  { %2050 = vmatpush3.bf16.msra.mxu0 %v2225_v17 }
 0x433   :  { %2051 = vmatprep.subr.bf16.mxu0 %v2382_v13 }
 0x434   :  { %2070 = vmatpush3.bf16.msra.mxu1 %v2233_v26 }
 0x435   :  { %2071 = vmatprep.subr.bf16.mxu1 %v2382_v13 }
 0x436   :  { %2052 = vmatpush3.bf16.msra.mxu0 %v2226_v18 }
 0x437   :  { %2053 = vmatprep.subr.bf16.mxu0 %v2382_v13 }
 0x438   :  { %2072 = vmatpush3.bf16.msra.mxu1 %v2234_v27 }
 0x439   :  { %2073 = vmatprep.subr.bf16.mxu1 %v2382_v13 }
 0x43a   :  { %2054 = vmatpush3.bf16.msra.mxu0 %v2227_v19 }
 0x43c   :  { %2074 = vmatpush3.bf16.msra.mxu1 %v2235_v29 }
 0x43d   :  { %2056 = vmatmul.mubr.bf16.vlgmr.msra.gmra.mxu0 %v1432_v20 }
 0x4dd   :  { %v1385_v30 = vpop.f32.mrf.mxu0  ;;  %v1426_v31 = vpop.f32.mrf.mxu1 }
 0x4de   :  { %v1644_v33 = vmax.f32 %v1426_v31, 0.0 }
 0x4df   :  { %v1387_v34 = vpop.f32.mrf.mxu0  ;;  %v2037_v35 = vpop.f32.mrf.mxu1 }
 0x4e0   :  { %v1652_v36 = vmul.f32 %v1815_v32, %v1644_v33 }
 0x4e1   :  { %v1389_v37 = vpop.f32.mrf.mxu0  ;;  %v1429_v38 = vpop.f32.mrf.mxu1 }
 0x4e2   :  { %1653 = vadd.xlane.f32.xlu1 %v1652_v36 }
 0x4e3   :  { %v1390_v39 = vpop.f32.mrf.mxu0  ;;  %v2038_v40 = vpop.f32.mrf.mxu1 }
 0x4fd   :  { %v1531_v41 = vpop.f32.mrf.mxu0 }
 0x4fe   :  { %v1532_v42 = vadd.f32 %v1531_v41, %v1387_v34 }
 0x4ff   :  { %v2057_v13 = vpop.f32.mrf.mxu0 }
 0x500   :  { %v1537_v43 = vmax.f32 %v1532_v42, 0.0 }
 0x501   :  { %v1534_v44 = vpop.f32.mrf.mxu0 }
 0x502   :  { %v1538_v45 = vpack.c.bf16 %v1537_v43, %v1537_v43 }
 0x503   :  { %v2058_v46 = vpop.f32.mrf.mxu0 }
 0x504   :  { %2076 = vmatmul.mubr.bf16.vlgmr.msra.gmra.mxu1 %v1538_v45 }
 0x56b   :  { %v1654_v47 = vpop.xlane.xlu1 %1653 }
 0x56c   :  { %v1816_v48 = vmul.f32 -1.442695, %v1654_v47 }
 0x56e   :  { %2240 = vpow2.f32 %v1816_v48 }
 0x57b   :  { %v2241_v49 = vpop.eup %2240 }
 0x57c   :  { %v1658_v50 = vadd.f32 1.0, %v2241_v49 }
 0x57e   :  { %2242 = vrcp.f32 %v1658_v50 }
 0x58b   :  { %v2243_v51 = vpop.eup %2242 }
 0x58c   :  { %v1662_v56 = vsub.f32 1.0, %v2243_v51  ;;  %v1661_v58 = vmul.f32 %v2243_v51, %v1385_v30 }
 0x5c4   :  { %v1637_v52 = vpop.f32.mrf.mxu1 }
 0x5c5   :  { %v1643_v55 = vsub.f32 %v2566_v28, %v1637_v52 }
 0x5c6   :  { %v2077_v57 = vpop.f32.mrf.mxu1 }
 0x5c7   :  { %v1663_v59 = vmul.f32 %v1662_v56, %v1643_v55 }
 0x5c8   :  { %v1640_v60 = vpop.f32.mrf.mxu1 }
 0x5c9   :  { %v1664_v61 = vadd.f32 %v1663_v59, %v1661_v58 }
 0x5ca   :  { %v2078_v62 = vpop.f32.mrf.mxu1 }
 0x5cb   :  { %v1668_v63 = vsel %vm1667_vm1, %v2243_v51, %v1664_v61 }
 0x5cc   :  { %1669 = vst [vmem:[%s2619_s11] sm:$0xff] %v1668_v63 }
 0x5cd   :  { %1674 = vsyncpa [#allocation3], 1 }
 0x5ce   :  { %1675 = vsyncpa [#allocation5], 1 }
 0x5cf   :  { %1676 = vsyncpa [#allocation8], 1 }
 0x5d0   :  { %1677 = vsyncpa [#allocation11], 1 }

</bundles_post_ra>
